<compile_context>
chip_gen: v7x
topology: tpu7x:2x2x1
jax: 0.10.0
libtpu: 0.0.40
codegen_flags: <defaults>
</compile_context>

<pallas_src>
import jax
import jax.numpy as jnp
from jax.experimental import pallas as pl
from jax.experimental.pallas import tpu as pltpu


def build_grid(resolution, min_max, dtype=jnp.float32):
    """JAX equivalent of the torch build_grid (indexing='ij'), without the
    leading batch dim: returns [len(resolution), *resolution]."""
    ranges = [jnp.linspace(min_max[0], min_max[1], num=res, dtype=dtype)
              for res in resolution]
    mesh = jnp.meshgrid(*ranges, indexing="ij")
    return jnp.stack(mesh, axis=0)


def _concat_grid_kernel(x_ref, g_ref, o_ref):
    # x_ref: (Bt, C*HW), g_ref: (1, G*HW), o_ref: (Bt, (C+G)*HW)
    n_x = x_ref.shape[1]
    o_ref[:, :n_x] = x_ref[...]
    o_ref[:, n_x:] = jnp.broadcast_to(
        g_ref[...], (x_ref.shape[0], g_ref.shape[1]))


def concat_grid(x, grid, *, vmem_block_budget_bytes=16 * 1024 * 1024):
    """x: [B, C, H, W], grid: [G, H, W] -> [B, C+G, H, W]."""
    B, C, H, W = x.shape
    G = grid.shape[0]
    assert grid.shape == (G, H, W)
    HW = H * W
    itemsize = jnp.dtype(x.dtype).itemsize

    # Lane-dense flattening (free reshapes for contiguous NCHW).
    xf = x.reshape(B, C * HW)
    gf = grid.astype(x.dtype).reshape(1, G * HW)

    # Batch-tile sizing: keep double-buffered input + output blocks under budget.
    bytes_per_row = 2 * (C * HW + (C + G) * HW) * itemsize
    b_tile = max(1, vmem_block_budget_bytes // max(1, bytes_per_row))
    if b_tile >= B or B < 8:
        b_tile = B                      # full batch in one block
    else:
        b_tile = max(8, (b_tile // 8) * 8)   # keep sublane dim a multiple of 8
    n_steps = pl.cdiv(B, b_tile)

    x_bytes = B * C * HW * itemsize
    g_bytes = G * HW * itemsize
    out_bytes = B * (C + G) * HW * itemsize
    cost = pl.CostEstimate(flops=0, transcendentals=0,
                           bytes_accessed=x_bytes + g_bytes + out_bytes)

    out_flat = pl.pallas_call(
        _concat_grid_kernel,
        out_shape=jax.ShapeDtypeStruct((B, (C + G) * HW), x.dtype),
        grid=(n_steps,),
        in_specs=[
            pl.BlockSpec((b_tile, C * HW), lambda b: (b, 0)),
            # grid buffer is batch-independent; constant block index -> fetched once
            pl.BlockSpec((1, G * HW), lambda b: (0, 0)),
        ],
        out_specs=pl.BlockSpec((b_tile, (C + G) * HW), lambda b: (b, 0)),
        compiler_params=pltpu.CompilerParams(
            dimension_semantics=("parallel",),
            vmem_limit_bytes=32 * 1024 * 1024,
        ),
        cost_estimate=cost,
    )(xf, gf)

    return out_flat.reshape(B, C + G, H, W)


class ConcatGrid:
    """Minimal JAX port of the PyTorch ConcatGrid module."""

    def __init__(self, resolution, min_max):
        self.grid = build_grid(resolution, min_max)  # [len(res), *res]

    def __call__(self, x):
        return concat_grid(x, self.grid)


if __name__ == "__main__":
    key = jax.random.PRNGKey(0)
    B, C, H, W = 2, 4, 16, 16

    x = jax.random.normal(key, (B, C, H, W), dtype=jnp.float32)

    module = ConcatGrid(resolution=(H, W), min_max=(-1.0, 1.0))
    out = module(x)
    out = jax.block_until_ready(out)

    # Reference check against plain JAX concat.
    grid_b = jnp.broadcast_to(module.grid[None], (B, 2, H, W))
    ref = jnp.concatenate([x, grid_b], axis=1)
    assert out.shape == (B, C + 2, H, W), out.shape
    assert jnp.allclose(out, ref), "mismatch vs reference"

    print("KERNEL_OK")
</pallas_src>

<mosaic_0001>
module attributes {stable_mosaic.version = 11 : i64} {
  func.func @_concat_grid_kernel(%arg0: i32, %arg1: memref<2x1024xf32, #tpu.memory_space<vmem>>, %arg2: memref<1x512xf32, #tpu.memory_space<vmem>>, %arg3: memref<2x1536xf32, #tpu.memory_space<vmem>>) attributes {dimension_semantics = [#tpu.dimension_semantics<parallel>], iteration_bounds = array<i64: 1>, scalar_prefetch = 0 : i64, scratch_operands = 0 : i64, tpu.core_type = #tpu.core_type<tc>, window_params = [{transform_indices = @transform_0, window_bounds = array<i64: 2, 1024>}, {pipeline_mode = #tpu.pipeline_mode<synchronous>, transform_indices = @transform_1, window_bounds = array<i64: 1, 512>}, {transform_indices = @transform_2, window_bounds = array<i64: 2, 1536>}]} {
    %c0 = arith.constant 0 : index
    %c0_0 = arith.constant 0 : index
    %0 = vector.load %arg1[%c0, %c0_0] : memref<2x1024xf32, #tpu.memory_space<vmem>>, vector<2x1024xf32>
    %c0_1 = arith.constant 0 : index
    %c0_2 = arith.constant 0 : index
    %1 = vector.load %arg3[%c0_1, %c0_2] : memref<2x1536xf32, #tpu.memory_space<vmem>>, vector<2x1024xf32>
    tpu.vector_store %arg3[%c0_1, %c0_2], %0 {strides = array<i32>} : memref<2x1536xf32, #tpu.memory_space<vmem>>, vector<2x1024xf32>,
    %c0_3 = arith.constant 0 : index
    %c0_4 = arith.constant 0 : index
    %2 = vector.load %arg2[%c0_3, %c0_4] : memref<1x512xf32, #tpu.memory_space<vmem>>, vector<1x512xf32>
    %3 = vector.shape_cast %2 : vector<1x512xf32> to vector<1x512xf32>
    %4 = vector.broadcast %3 : vector<1x512xf32> to vector<2x512xf32>
    %c0_5 = arith.constant 0 : index
    %c1024 = arith.constant 1024 : index
    %5 = vector.load %arg3[%c0_5, %c1024] : memref<2x1536xf32, #tpu.memory_space<vmem>>, vector<2x512xf32>
    tpu.vector_store %arg3[%c0_5, %c1024], %4 {strides = array<i32>} : memref<2x1536xf32, #tpu.memory_space<vmem>>, vector<2x512xf32>,
    return
  }
  func.func @transform_0(%arg0: i32) -> (i32, i32) {
    %c0_i32 = arith.constant 0 : i32
    %c0_i32_0 = arith.constant 0 : i32
    return %arg0, %c0_i32 : i32, i32
  }
  func.func @transform_1(%arg0: i32) -> (i32, i32) {
    %c0_i32 = arith.constant 0 : i32
    %c0_i32_0 = arith.constant 0 : i32
    %c0_i32_1 = arith.constant 0 : i32
    return %c0_i32, %c0_i32_0 : i32, i32
  }
  func.func @transform_2(%arg0: i32) -> (i32, i32) {
    %c0_i32 = arith.constant 0 : i32
    %c0_i32_0 = arith.constant 0 : i32
    return %arg0, %c0_i32 : i32, i32
  }
}

</mosaic_0001>

<bundles_post_ra>
// kernel: tpu_custom_call.1
= control target key start
LH: loop header
LB: loop body
LE: loop exit
PB: predicated region body
PF: predicated region fallthrough
CT: control target
= control target key end

     0   :  { %7 = vsyncpa [#allocation3], 0  ;;  %s224_s0 = inlined_call_operand.hbm [shape: f32[2,1024], index: 0, kind: input, shape index: {}]   ;;  %s225_s1 = inlined_call_operand.hbm [shape: f32[1,512], index: 1, kind: input, shape index: {}]   ;;  %s226_s2 = inlined_call_operand.hbm [shape: f32[2,1536], index: 2, kind: output, shape index: {}]  }
   0x1   :  { %8 = vsyncpa [#allocation6], 0 }
   0x2   :  { %9 = vsyncpa [#allocation4], 0  ;;  %s169_s9 = smov [#allocation2]   ;;  %s170_s11 = smov [#allocation5]  }
   0x3   :  { %s16_s10 = sshll.u32 %s169_s9, 4  ;;  %s26_s12 = sshll.u32 %s170_s11, 4  ;;  %s17_s10 = int_to_ptr.vmem [resolvable:$true] %s16_s10  ;;  %s27_s12 = int_to_ptr.vmem [resolvable:$true] %s26_s12 }
   0x4   :  { %s97_s15 = scalar_lea.hbm %s224_s0, 256 }
   0x5   :  { %p98_p0 = scmp.ne.s32.totalorder %s224_s0, %s97_s15  ;;  %p101_p1 = scmp.lt.u32.totalorder %s97_s15, %s224_s0 }
   0x7   :  { %p103_p2 = pnand %p101_p1, %p98_p0 }
   0x9   :  { %106 = shalt.err (!%p103_p2)
}
   0xa   :  { %s107_s20 = scalar_lea.vmem %s17_s10, 256  ;;  %p112_p4 = scmp.lt.s32.totalorder %s17_s10, %s17_s10 }
   0xb   :  { %p108_p3 = scmp.ne.s32.totalorder %s17_s10, %s107_s20  ;;  %p113_p5 = scmp.lt.s32.totalorder %s107_s20, %s107_s20 }
   0xd   :  { %p114_p6 = por %p113_p5, %p112_p4 }
   0xf   :  { %p115_p7 = pnand %p114_p6, %p108_p3 }
  0x11   :  { %118 = shalt.err (!%p115_p7)
}
  0x12   :  { %19 = dma.hbm_to_vmem [thread:$0]  %s224_s0, 256, %s17_s10, [#allocation3]  }
  0x13   :  { %s119_s25 = scalar_lea.hbm %s225_s1, 64 }
  0x14   :  { %p120_p8 = scmp.ne.s32.totalorder %s225_s1, %s119_s25  ;;  %p123_p9 = scmp.lt.u32.totalorder %s119_s25, %s225_s1 }
  0x16   :  { %p125_p10 = pnand %p123_p9, %p120_p8 }
  0x18   :  { %128 = shalt.err (!%p125_p10)
}
  0x19   :  { %s129_s30 = scalar_lea.vmem %s27_s12, 64  ;;  %p134_p12 = scmp.lt.s32.totalorder %s27_s12, %s27_s12 }
  0x1a   :  { %p130_p11 = scmp.ne.s32.totalorder %s27_s12, %s129_s30  ;;  %p135_p13 = scmp.lt.s32.totalorder %s129_s30, %s129_s30 }
  0x1c   :  { %p136_p0 = por %p135_p13, %p134_p12 }
  0x1e   :  { %p137_p1 = pnand %p136_p0, %p130_p11 }
  0x20   :  { %140 = shalt.err (!%p137_p1)
}
  0x21   :  { %29 = dma.hbm_to_vmem [thread:$0]  %s225_s1, 64, %s27_s12, [#allocation6]  }
  0x22   :  { %163 = dma.done.wait [#allocation3], 256  }
  0x23   :  { %164 = vsyncadd [#allocation3], 4294967040 }
  0x24   :  { %165 = dma.done.wait [#allocation6], 64  }
  0x25   :  { %166 = vsyncadd [#allocation6], 4294967232  ;;  %v42_v0 = vlaneseq  ;;  %v171_v1 = vmov 1983009808   ;;  %v36_v9 = vld [vmem:[#allocation2] sm:$0xff]  ;;  %v37_v10 = vld [vmem:[#allocation2 + $0x8] sm:$0xff] }
  0x26   :  { %v61_v2 = vunpack.c.l.s4 %v171_v1  ;;  %v40_v11 = vld [vmem:[#allocation5] sm:$0xf]  ;;  %38 = vst [vmem:[#allocation7] sm:$0xff] %v36_v9  ;;  %39 = vst [vmem:[#allocation7 + $0x8] sm:$0xff] %v37_v10  ;;  %s172_s1 = smov [#allocation7]  }
  0x27   :  { %v43_v3 = vshrl.u32 %v42_v0, 7  ;;  %s83_s4 = sshll.u32 %s172_s1, 4  ;;  %s84_s4 = int_to_ptr.vmem [resolvable:$true] %s83_s4 }
  0x28   :  { %v62_v4 = vunpack.c.0.s8 %v61_v2  ;;  %s141_s5 = scalar_lea.vmem %s84_s4, 384  ;;  %p146_p3 = scmp.lt.s32.totalorder %s84_s4, %s84_s4 }
  0x29   :  { %v44_v5 = vsub.s32 0, %v43_v3  ;;  %v48_v6 = vsub.s32 1, %v43_v3  ;;  %v52_v7 = vsub.s32 2, %v43_v3  ;;  %v56_v8 = vsub.s32 3, %v43_v3  ;;  %p142_p2 = scmp.ne.s32.totalorder %s84_s4, %s141_s5  ;;  %p147_p4 = scmp.lt.s32.totalorder %s141_s5, %s141_s5 }
  0x2a   :  { %v65_v12 = vsub.s32 %v62_v4, %v43_v3 }
  0x2b   :  { %v45_v13 = vrot.slane %v40_v11, %v44_v5  ;;  %v49_v14 = vrot.slane %v40_v11, %v48_v6  ;;  %v53_v15 = vrot.slane %v40_v11, %v52_v7  ;;  %v57_v16 = vrot.slane %v40_v11, %v56_v8  ;;  %p148_p5 = por %p147_p4, %p146_p3 }
  0x2d   :  { %v58_v17 = vcombine.low %v45_v13, %v49_v14  ;;  %v59_v18 = vcombine.low %v53_v15, %v57_v16  ;;  %p149_p6 = pnand %p148_p5, %p142_p2 }
  0x2f   :  { %v66_v19 = vrot.slane %v58_v17, %v65_v12  ;;  %v73_v20 = vrot.slane %v59_v18, %v65_v12 }
  0x31   :  { %v74_v21 = vcombine.low %v66_v19, %v73_v20 }
  0x33   :  { %76 = vst [vmem:[#allocation7 + $0x10] sm:$0xff] %v74_v21 }
  0x34   :  { %152 = shalt.err (!%p149_p6)
}
  0x35   :  { %s153_s8 = scalar_lea.hbm %s226_s2, 384 }
  0x36   :  { %p154_p7 = scmp.ne.s32.totalorder %s226_s2, %s153_s8  ;;  %p157_p8 = scmp.lt.u32.totalorder %s153_s8, %s226_s2 }
  0x38   :  { %p159_p9 = pnand %p157_p8, %p154_p7 }
  0x3a   :  { %162 = shalt.err (!%p159_p9)
}
  0x3b   :  { %86 = dma.vmem_to_hbm [thread:$0]  %s84_s4, 384, %s226_s2, [#allocation4]  }
  0x3c   :  { %167 = dma.done.wait [#allocation4], 384  }
  0x3d   :  { %168 = vsyncadd [#allocation4], 4294966912 }
  0x3e   :  { %90 = vsyncpa [#allocation3], 1 }
  0x3f   :  { %91 = vsyncpa [#allocation6], 1 }
  0x40   :  { %92 = vsyncpa [#allocation4], 1 }

</bundles_post_ra>
